<compile_context>
chip_gen: v5e
topology: v5e:2x2
jax: 0.10.0
libtpu: 0.0.40
codegen_flags: <defaults>
</compile_context>

<pallas_src>
import jax
import jax.numpy as jnp
from jax.experimental import pallas as pl
from jax.experimental.pallas import tpu as pltpu


def _color_precompute_kernel(cam_ref, g_ref, o_ref):
    # Abstract-base forward defines no transform: emit this tile's gaussian
    # color features unchanged. cam_ref (SMEM) is where a concrete subclass
    # reads per-camera scalars (view direction, exposure, ...) for its math.
    # TODO(synk): ColorPrecompute.forward is NotImplementedError upstream;
    #             concrete SH/color evaluation belongs to subclasses only.
    del cam_ref
    o_ref[...] = g_ref[...]


def color_precompute(
    gaussians: jax.Array,
    camera: jax.Array,
    *,
    lane: int = 512,              # multiple of 128 -> lane-dense, unmasked stores
    block_bytes: int = 2 << 20,   # ~2 MiB per block: VMEM-safe on v5e/v6e/v7x
) -> jax.Array:
    """Pallas wrapper mirroring ColorPrecompute.forward(gaussians, camera).

    gaussians: [N, C] per-gaussian color features.
    camera:    [CAM_DIM] camera parameters (unused by the abstract base class).
    returns:   [N, C] precomputed colors (identity for the base class).
    """
    n, c = gaussians.shape
    total = n * c
    itemsize = jnp.dtype(gaussians.dtype).itemsize
    sublane = max(8, 32 // itemsize)  # 8 rows (f32) / 16 (bf16) / 32 (int8)

    # Lane-dense slab layout: flatten and re-tile to [rows, lane].
    rows = pl.cdiv(total, lane)
    tile_r = min(max(block_bytes // (lane * itemsize), sublane), rows)
    tile_r = max(sublane, (tile_r // sublane) * sublane)
    rows_pad = pl.cdiv(rows, tile_r) * tile_r
    padded = rows_pad * lane

    flat = gaussians.reshape(-1)
    if padded != total:
        flat = jnp.pad(flat, (0, padded - total))
    slab = flat.reshape(rows_pad, lane)

    grid = (rows_pad // tile_r,)
    out = pl.pallas_call(
        _color_precompute_kernel,
        out_shape=jax.ShapeDtypeStruct((rows_pad, lane), gaussians.dtype),
        grid=grid,
        in_specs=[
            # camera: tiny parameter vector, resident in SMEM (no per-step VMEM DMA)
            pl.BlockSpec(memory_space=pltpu.MemorySpace.SMEM),
            # gaussians slab: large lane-dense row tiles
            pl.BlockSpec((tile_r, lane), lambda i: (i, 0)),
        ],
        out_specs=pl.BlockSpec((tile_r, lane), lambda i: (i, 0)),
        # Alias the gaussian slab (input index 1) to the output buffer.
        input_output_aliases={1: 0},
        compiler_params=pltpu.CompilerParams(
            # Memcpy-class kernel: megacore sharding buys nothing at the HBM
            # roofline, so keep the single grid axis "arbitrary". Flip to
            # "parallel" once a concrete subclass adds real per-gaussian compute.
            dimension_semantics=("arbitrary",),
        ),
    )(camera, slab)

    return out.reshape(-1)[:total].reshape(n, c)


if __name__ == "__main__":
    key = jax.random.PRNGKey(0)
    k_g, k_cam = jax.random.split(key)

    # Small deterministic inputs consistent with a gaussian-splat color
    # precompute: 300 gaussians x 16 color/SH features, 8-dim camera vector.
    # (300 is deliberately NOT a multiple of the tile: exercises the pad path.)
    N, C, CAM_DIM = 300, 16, 8
    gaussians = jax.random.normal(k_g, (N, C), dtype=jnp.float32)
    camera = jax.random.normal(k_cam, (CAM_DIM,), dtype=jnp.float32)

    fn = jax.jit(color_precompute)
    out = jax.block_until_ready(fn(gaussians, camera))

    # Reference semantics of the (abstract) base class hot path: passthrough.
    assert out.shape == gaussians.shape
    assert out.dtype == gaussians.dtype
    assert bool(jnp.allclose(out, gaussians))

    print("KERNEL_OK")
</pallas_src>

<mosaic_0001>
module attributes {stable_mosaic.version = 11 : i64} {
  func.func @_color_precompute_kernel(%arg0: i32, %arg1: memref<8xf32, #tpu.memory_space<smem>>, %arg2: memref<8x512xf32, #tpu.memory_space<vmem>>, %arg3: memref<8x512xf32, #tpu.memory_space<vmem>>) attributes {dimension_semantics = [#tpu.dimension_semantics<arbitrary>], iteration_bounds = array<i64: 2>, scalar_prefetch = 0 : i64, scratch_operands = 0 : i64, tpu.core_type = #tpu.core_type<tc>, window_params = [{transform_indices = @transform_0, window_bounds = array<i64: 8>}, {transform_indices = @transform_1, window_bounds = array<i64: 8, 512>}, {transform_indices = @transform_2, window_bounds = array<i64: 8, 512>}]} {
    %c0 = arith.constant 0 : index
    %c0_0 = arith.constant 0 : index
    %0 = vector.load %arg2[%c0, %c0_0] : memref<8x512xf32, #tpu.memory_space<vmem>>, vector<8x512xf32>
    %c0_1 = arith.constant 0 : index
    %c0_2 = arith.constant 0 : index
    %1 = vector.load %arg3[%c0_1, %c0_2] : memref<8x512xf32, #tpu.memory_space<vmem>>, vector<8x512xf32>
    tpu.vector_store %arg3[%c0_1, %c0_2], %0 {strides = array<i32>} : memref<8x512xf32, #tpu.memory_space<vmem>>, vector<8x512xf32>,
    return
  }
  func.func @transform_0(%arg0: i32) -> i32 {
    %c0_i32 = arith.constant 0 : i32
    %c0_i32_0 = arith.constant 0 : i32
    return %c0_i32 : i32
  }
  func.func @transform_1(%arg0: i32) -> (i32, i32) {
    %c0_i32 = arith.constant 0 : i32
    %c0_i32_0 = arith.constant 0 : i32
    return %arg0, %c0_i32 : i32, i32
  }
  func.func @transform_2(%arg0: i32) -> (i32, i32) {
    %c0_i32 = arith.constant 0 : i32
    %c0_i32_0 = arith.constant 0 : i32
    return %arg0, %c0_i32 : i32, i32
  }
}

</mosaic_0001>

<bundles_post_ra>
// kernel: color_precompute.1
= control target key start
LH: loop header
LB: loop body
LE: loop exit
PB: predicated region body
PF: predicated region fallthrough
CT: control target
= control target key end

     0   :  { %7 = vsyncpa [#allocation3], 0  ;;  %s310_s9 = smov 0   ;;  %s330_s0 = inlined_call_operand.vmem [shape: f32[8], index: 0, kind: input, shape index: {}]   ;;  %s331_s1 = inlined_call_operand.vmem [shape: f32[16,512], index: 1, kind: input, shape index: {}, may-alias: {1,2}]   ;;  %s332_s2 = inlined_call_operand.vmem [shape: f32[16,512], index: 2, kind: output, shape index: {}, may-alias: {1,2}]  }
   0x1 LB: > { %s233_s10 = sadd.s32 4294967295, %s292_s9   ;;  %p235_p0 = scmp.ge.s32.totalorder %s292_s9, 1  ;;  %s292_s9 = sphi %s310_s9, %s13_s9  }
   0x2   : > { %p91_p1 = scmp.lt.s32.totalorder %s292_s9, 3  ;;  %s103_s13 = sshll.u32 %s330_s0, 4  ;;  %s104_s13 = int_to_ptr.vmem [resolvable:$true] %s103_s13 }
   0x3   : > { %p256_p3 = scmp.eq.s32.totalorder %s233_s10, 0  ;;  %s294_s14 = smov [#allocation2]  }
   0x4   : > { %p92_p2 = pnand %p235_p0, %p91_p1 }
   0x6   : > { %p252_p4 = pneg %p92_p2  ;;  %124 = sbr.rel (%p92_p2) target bundleno = 25 (0x19), region = 28 }
   0x8   : > { %p253_p5 = pnand %p256_p3, %p252_p4 }
   0xa   : > { %255 = dma.vmem_to_smem (!%p253_p5), %s104_s13, 16, %s294_s14, [#allocation3]  }
   0xb   : > { %287 = dma.done.wait (%p256_p3), [#allocation3], 16  }
   0xc   : > { %289 = vsyncadd (%p256_p3), [#allocation3], 4294967280 }
   0xd   : > { %131 = sfence }
   0xe   : > { %p148_p6 = scmp.lt.s32.totalorder %s233_s10, 1 }
  0x10   : > { %s334_s10 = smov (!%p148_p6, %s233_s10), 1 }
  0x11   : > { %s246_s15 = sshll.u32 %s334_s10, 5 }
  0x12   : > { %s152_s18 = scalar_lea.vmem %s331_s1, %s246_s15  ;;  %s157_s21 = scalar_lea.vmem %s332_s2, %s246_s15 }
  0x13   : > { %v158_v0 = vld [vmem:[%s152_s18] sm:$0xff]  ;;  %v159_v1 = vld [vmem:[%s152_s18 + $0x8] sm:$0xff]  ;;  %v160_v2 = vld [vmem:[%s152_s18 + $0x10] sm:$0xff] }
  0x14   : > { %v161_v3 = vld [vmem:[%s152_s18 + $0x18] sm:$0xff] }
  0x15   : > { %162 = vst [vmem:[%s157_s21] sm:$0xff] %v158_v0 }
  0x16   : > { %163 = vst [vmem:[%s157_s21 + $0x8] sm:$0xff] %v159_v1 }
  0x17   : > { %164 = vst [vmem:[%s157_s21 + $0x10] sm:$0xff] %v160_v2 }
  0x18   : > { %165 = vst [vmem:[%s157_s21 + $0x18] sm:$0xff] %v161_v3 }
  0x19 PF: > { %s13_s9 = sadd.s32 1, %s292_s9  }
  0x1a   : > { %p10_p7 = scmp.ge.s32.totalorder %s13_s9, 4  }
  0x1c   :  { %12 = sbr.rel (!%p10_p7) target bundleno = 1 (0x1), region = 63 }
  0x21   :  { %187 = vsyncpa [#allocation3], 1 }
  0x22   :  { %189 = vsyncpa [#allocation3 + $0x1], 1 }

</bundles_post_ra>
